<compile_context>
chip_gen: v7x
topology: tpu7x:2x2x1
jax: 0.10.0
libtpu: 0.0.40
codegen_flags: <defaults>
</compile_context>

<pallas_src>
import jax
import jax.numpy as jnp
from jax.experimental import pallas as pl
from jax.experimental.pallas import tpu as pltpu


def _round_up(x, m):
    return (x + m - 1) // m * m


# ---------------------------------------------------------------------------
# Kernels
# ---------------------------------------------------------------------------
def fused_embed_kernel(patches_ref, w_ref, b_ref, out_ref):
    """Single MXU matmul: conv stem and Linear pre-fused into one weight.

    patches_ref : (TM, K1)  bf16 im2col'd patch rows (row tile)
    w_ref       : (K1, E)   bf16 fused weight (conv @ proj)
    b_ref       : (1, E)    f32  fused bias
    out_ref     : (TM, E)   final dtype
    """
    out = jnp.dot(patches_ref[...], w_ref[...],
                  preferred_element_type=jnp.float32) + b_ref[...]
    out_ref[...] = out.astype(out_ref.dtype)


def two_matmul_embed_kernel(patches_ref, wc_ref, bc_ref, wp_ref, bp_ref,
                            out_ref, feat_ref):
    """Two MXU matmuls; intermediate feature staged in a bf16 VMEM scratch.

    patches_ref : (TM, K1)  bf16
    wc_ref      : (K1, F)   bf16 conv weight (flattened, transposed)
    bc_ref      : (1, F)    f32
    wp_ref      : (F, E)    bf16 proj weight (transposed)
    bp_ref      : (1, E)    f32
    out_ref     : (TM, E)   final dtype
    feat_ref    : (TM, F)   bf16 VMEM scratch
    """
    feat = jnp.dot(patches_ref[...], wc_ref[...],
                   preferred_element_type=jnp.float32) + bc_ref[...]
    feat_ref[...] = feat.astype(feat_ref.dtype)
    out = jnp.dot(feat_ref[...], wp_ref[...],
                  preferred_element_type=jnp.float32) + bp_ref[...]
    out_ref[...] = out.astype(out_ref.dtype)


# ---------------------------------------------------------------------------
# Wrapper
# ---------------------------------------------------------------------------
def hybrid_embed(x, conv_w, conv_b, proj_w, proj_b, *, patch, tm=1024,
                 compute_dtype=jnp.bfloat16, out_dtype=None, fuse=None):
    """x: (N, C, H, W) NCHW.  Returns (N, num_patches, embed_dim)."""
    N, C, H, W = x.shape
    K = patch
    Hf, Wf = H // K, W // K
    F = conv_w.shape[0]                 # backbone feature_dim
    E = proj_w.shape[0]                 # embed_dim
    M = N * Hf * Wf
    K1 = C * K * K
    out_dtype = x.dtype if out_dtype is None else out_dtype

    # Row tile: a multiple of 8 (tm default 1024), or the full M when M is
    # small (full-dim blocks are always layout-legal).  grid = cdiv(M, TM):
    # Pallas clamps the ragged last block, so no zero row padding, no wasted
    # matmul work and no final row slice.
    TM = M if M <= tm else tm
    grid = (pl.cdiv(M, TM),)

    # im2col for a stride==kernel conv (non-overlapping patches), done in
    # bf16 so this single wrapper-side pass moves half the bytes.  Row order
    # (n, i, j) matches torch's flatten(2).transpose(1, 2).
    # TODO(synk): fold the (C,K,K)->K1 rearrangement into the kernel (x with
    # memory_space=pl.ANY, gather (n, i) row-blocks in VMEM) to remove this
    # extra HBM round-trip entirely.
    patches = (x.astype(compute_dtype)
                 .reshape(N, C, Hf, K, Wf, K)
                 .transpose(0, 2, 4, 1, 3, 5)        # (N, Hf, Wf, C, K, K)
                 .reshape(M, K1))

    wc_t = conv_w.reshape(F, K1).T.astype(jnp.float32)   # (K1, F)
    wp_t = proj_w.T.astype(jnp.float32)                  # (F, E)

    in_isz = jnp.dtype(compute_dtype).itemsize
    out_isz = jnp.dtype(out_dtype).itemsize
    lane = lambda d: _round_up(d, 128)   # internal VMEM lane padding estimate

    if fuse is None:
        # Per output row the fused path streams/computes ~K1*E (weight bytes
        # and MACs); the two-matmul path ~F*(K1+E) plus a scratch pass.  When
        # the kernel is HBM-bound (fused arithmetic intensity below even the
        # v5e ~240 flop/byte roofline crossover) the single fused matmul wins
        # on every generation; otherwise pick the FLOP-minimal factorisation
        # (matters on v5e's 197 TF/s MXU).
        intensity = (K1 * E) / max(K1 + E, 1)
        fuse = (intensity < 240.0) or (K1 * E <= F * (K1 + E))
        fuse = fuse and (K1 * E * in_isz <= 8 * 1024 * 1024)  # weight resident

    def _vmem_limit(step_bytes):
        # Generous margin over the double-buffered per-step footprint, clamped
        # to what is safe on all of v5e (16 MiB default scoped) .. v7x (64 MiB
        # physical VMEM).
        return int(min(64 * 1024 * 1024,
                       max(2 * step_bytes, 16 * 1024 * 1024)))

    if fuse:
        w_fused = (wc_t @ wp_t).astype(compute_dtype)                  # (K1, E)
        b_fused = (conv_b.astype(jnp.float32) @ wp_t
                   + proj_b.astype(jnp.float32)).reshape(1, E)
        step_bytes = (2 * TM * lane(K1) * in_isz          # patches (dbl buf)
                      + 2 * TM * lane(E) * out_isz        # output  (dbl buf)
                      + 2 * (lane(K1) * lane(E) * in_isz + lane(E) * 4))
        out = pl.pallas_call(
            fused_embed_kernel,
            out_shape=jax.ShapeDtypeStruct((M, E), out_dtype),
            grid=grid,
            in_specs=[
                pl.BlockSpec((TM, K1), lambda i: (i, 0)),
                pl.BlockSpec((K1, E), lambda i: (0, 0)),
                pl.BlockSpec((1, E), lambda i: (0, 0)),
            ],
            out_specs=pl.BlockSpec((TM, E), lambda i: (i, 0)),
            compiler_params=pltpu.CompilerParams(
                dimension_semantics=("parallel",),
                vmem_limit_bytes=_vmem_limit(step_bytes)),
            cost_estimate=pl.CostEstimate(
                flops=2 * M * K1 * E, transcendentals=0,
                bytes_accessed=(M * K1 * in_isz + K1 * E * in_isz
                                + E * 4 + M * E * out_isz)),
        )(patches, w_fused, b_fused)
    else:
        wc = wc_t.astype(compute_dtype)                                # (K1, F)
        bc = conv_b.astype(jnp.float32).reshape(1, F)
        wp = wp_t.astype(compute_dtype)                                # (F, E)
        bp = proj_b.astype(jnp.float32).reshape(1, E)
        step_bytes = (2 * TM * lane(K1) * in_isz
                      + 2 * TM * lane(E) * out_isz
                      + 2 * ((lane(K1) * lane(F) + lane(F) * lane(E)) * in_isz
                             + (lane(F) + lane(E)) * 4)
                      + TM * lane(F) * in_isz)           # bf16 feature scratch
        out = pl.pallas_call(
            two_matmul_embed_kernel,
            out_shape=jax.ShapeDtypeStruct((M, E), out_dtype),
            grid=grid,
            in_specs=[
                pl.BlockSpec((TM, K1), lambda i: (i, 0)),
                pl.BlockSpec((K1, F), lambda i: (0, 0)),
                pl.BlockSpec((1, F), lambda i: (0, 0)),
                pl.BlockSpec((F, E), lambda i: (0, 0)),
                pl.BlockSpec((1, E), lambda i: (0, 0)),
            ],
            out_specs=pl.BlockSpec((TM, E), lambda i: (i, 0)),
            scratch_shapes=[pltpu.VMEM((TM, F), compute_dtype)],
            compiler_params=pltpu.CompilerParams(
                dimension_semantics=("parallel",),
                vmem_limit_bytes=_vmem_limit(step_bytes)),
            cost_estimate=pl.CostEstimate(
                flops=2 * M * (K1 * F + F * E), transcendentals=0,
                bytes_accessed=(M * K1 * in_isz
                                + (K1 * F + F * E) * in_isz
                                + (F + E) * 4 + M * E * out_isz)),
        )(patches, wc, bc, wp, bp)

    return out.reshape(N, Hf * Wf, E)


def reference(x, conv_w, conv_b, proj_w, proj_b, *, patch):
    """Pure-JAX fp32 reference mirroring the PyTorch forward."""
    feat = jax.lax.conv_general_dilated(
        x, conv_w, window_strides=(patch, patch), padding="VALID",
        dimension_numbers=("NCHW", "OIHW", "NCHW"))
    feat = feat + conv_b.reshape(1, -1, 1, 1)
    N, Cf, Hf, Wf = feat.shape
    feat = feat.reshape(N, Cf, Hf * Wf).transpose(0, 2, 1)   # flatten(2).T
    return feat @ proj_w.T + proj_b


if __name__ == "__main__":
    key = jax.random.PRNGKey(0)

    def make_inputs(k, N, C, H, W, F, E, patch, scale=0.05):
        kx, kwc, kbc, kwp, kbp = jax.random.split(k, 5)
        x = jax.random.normal(kx, (N, C, H, W), jnp.float32)
        conv_w = jax.random.normal(kwc, (F, C, patch, patch), jnp.float32) * scale
        conv_b = jax.random.normal(kbc, (F,), jnp.float32) * scale
        proj_w = jax.random.normal(kwp, (E, F), jnp.float32) * scale
        proj_b = jax.random.normal(kbp, (E,), jnp.float32) * scale
        return x, conv_w, conv_b, proj_w, proj_b

    configs = [
        # fused single-matmul path (auto heuristic picks it)
        dict(N=2, C=4, H=16, W=16, F=16, E=32, patch=4, kw={}),
        # two-matmul + bf16 VMEM scratch path (forced, to exercise the branch)
        dict(N=2, C=4, H=16, W=16, F=64, E=32, patch=4, kw=dict(fuse=False)),
        # multi-tile grid with a ragged last block (M=512, TM=120 -> 5 tiles)
        dict(N=2, C=3, H=64, W=64, F=96, E=128, patch=4, kw=dict(tm=120)),
    ]
    for cfg, k in zip(configs, jax.random.split(key, len(configs))):
        x, cw, cb, pw, pb = make_inputs(
            k, cfg["N"], cfg["C"], cfg["H"], cfg["W"],
            cfg["F"], cfg["E"], cfg["patch"])
        out = hybrid_embed(x, cw, cb, pw, pb, patch=cfg["patch"], **cfg["kw"])
        out = jax.block_until_ready(out)

        ref = reference(x, cw, cb, pw, pb, patch=cfg["patch"])
        Hf, Wf = cfg["H"] // cfg["patch"], cfg["W"] // cfg["patch"]
        assert out.shape == (cfg["N"], Hf * Wf, cfg["E"]), out.shape
        # bf16 inputs/weights with fp32 MXU accumulation -> loosened tolerance.
        assert jnp.allclose(out.astype(jnp.float32), ref,
                            atol=2e-2, rtol=2e-2), "mismatch vs reference"

    print("KERNEL_OK")
</pallas_src>

<mosaic_0001>
module attributes {stable_mosaic.version = 11 : i64} {
  func.func @fused_embed_kernel(%arg0: i32, %arg1: memref<32x64xbf16, #tpu.memory_space<vmem>>, %arg2: memref<64x32xbf16, #tpu.memory_space<vmem>>, %arg3: memref<1x32xf32, #tpu.memory_space<vmem>>, %arg4: memref<32x32xf32, #tpu.memory_space<vmem>>) attributes {dimension_semantics = [#tpu.dimension_semantics<parallel>], iteration_bounds = array<i64: 1>, scalar_prefetch = 0 : i64, scratch_operands = 0 : i64, tpu.core_type = #tpu.core_type<tc>, window_params = [{transform_indices = @transform_0, window_bounds = array<i64: 32, 64>}, {pipeline_mode = #tpu.pipeline_mode<synchronous>, transform_indices = @transform_1, window_bounds = array<i64: 64, 32>}, {pipeline_mode = #tpu.pipeline_mode<synchronous>, transform_indices = @transform_2, window_bounds = array<i64: 1, 32>}, {transform_indices = @transform_3, window_bounds = array<i64: 32, 32>}]} {
    %c0 = arith.constant 0 : index
    %c0_0 = arith.constant 0 : index
    %0 = vector.load %arg1[%c0, %c0_0] : memref<32x64xbf16, #tpu.memory_space<vmem>>, vector<32x64xbf16>
    %c0_1 = arith.constant 0 : index
    %c0_2 = arith.constant 0 : index
    %1 = vector.load %arg2[%c0_1, %c0_2] : memref<64x32xbf16, #tpu.memory_space<vmem>>, vector<64x32xbf16>
    %cst = arith.constant dense<0.000000e+00> : vector<32x32xf32>
    %2 = tpu.matmul %0, %1, %cst {dimension_numbers = #tpu.dot_dimension_numbers<[1], [0], [0], [1], [0, 0, 1, 1], [], []>} : vector<32x64xbf16>, vector<64x32xbf16>, vector<32x32xf32> -> vector<32x32xf32>
    %c0_3 = arith.constant 0 : index
    %c0_4 = arith.constant 0 : index
    %3 = vector.load %arg3[%c0_3, %c0_4] : memref<1x32xf32, #tpu.memory_space<vmem>>, vector<1x32xf32>
    %4 = vector.broadcast %3 : vector<1x32xf32> to vector<32x32xf32>
    %5 = arith.addf %2, %4 : vector<32x32xf32>
    %c0_5 = arith.constant 0 : index
    %c0_6 = arith.constant 0 : index
    %6 = vector.load %arg4[%c0_5, %c0_6] : memref<32x32xf32, #tpu.memory_space<vmem>>, vector<32x32xf32>
    tpu.vector_store %arg4[%c0_5, %c0_6], %5 {strides = array<i32>} : memref<32x32xf32, #tpu.memory_space<vmem>>, vector<32x32xf32>,
    return
  }
  func.func @transform_0(%arg0: i32) -> (i32, i32) {
    %c0_i32 = arith.constant 0 : i32
    %c0_i32_0 = arith.constant 0 : i32
    return %arg0, %c0_i32 : i32, i32
  }
  func.func @transform_1(%arg0: i32) -> (i32, i32) {
    %c0_i32 = arith.constant 0 : i32
    %c0_i32_0 = arith.constant 0 : i32
    %c0_i32_1 = arith.constant 0 : i32
    return %c0_i32, %c0_i32_0 : i32, i32
  }
  func.func @transform_2(%arg0: i32) -> (i32, i32) {
    %c0_i32 = arith.constant 0 : i32
    %c0_i32_0 = arith.constant 0 : i32
    %c0_i32_1 = arith.constant 0 : i32
    return %c0_i32, %c0_i32_0 : i32, i32
  }
  func.func @transform_3(%arg0: i32) -> (i32, i32) {
    %c0_i32 = arith.constant 0 : i32
    %c0_i32_0 = arith.constant 0 : i32
    return %arg0, %c0_i32 : i32, i32
  }
}

</mosaic_0001>

<bundles_post_ra>
// kernel: tpu_custom_call.1
= control target key start
LH: loop header
LB: loop body
LE: loop exit
PB: predicated region body
PF: predicated region fallthrough
CT: control target
= control target key end

     0   :  { %vm69_vm0 = vcmask 523264   ;;  %s262_s0 = inlined_call_operand.vmem [shape: bf16[32,64], index: 0, kind: input, shape index: {}]   ;;  %s263_s1 = inlined_call_operand.vmem [shape: bf16[64,32], index: 1, kind: input, shape index: {}]   ;;  %s264_s2 = inlined_call_operand.vmem [shape: f32[1,32], index: 2, kind: input, shape index: {}]   ;;  %s265_s3 = inlined_call_operand.hbm [shape: f32[32,32], index: 3, kind: output, shape index: {}]  }
   0x1   :  { %v176_v0 = vld [vmem:[%s263_s1] sm:$0xff]   ;;  %v177_v1 = vld [vmem:[%s263_s1 + $0x8] sm:$0xff]   ;;  %v178_v2 = vld [vmem:[%s263_s1 + $0x10] sm:$0xff]  }
   0x2   :  { %161 = vmatprep.subr.bf16.mxu0 %v176_v0  ;;  %v180_v3 = vld [vmem:[%s262_s0] sm:$0xff]  }
   0x3   :  { %162 = vmatpush3.bf16.msra.mxu0 %v176_v0  ;;  %169 = vmatprep.mubr.msk.bf16.mxu0 %vm69_vm0, %v180_v3 }
   0x4   :  { %163 = vmatprep.subr.bf16.mxu0 %v177_v1 }
   0x5   :  { %8 = vsyncpa [#allocation3], 0  ;;  %v179_v4 = vld [vmem:[%s263_s1 + $0x18] sm:$0xff]   ;;  %v181_v5 = vld [vmem:[%s262_s0 + $0x8] sm:$0xff]   ;;  %vm125_vm1 = vcmask 261120   ;;  %s206_s26 = smov [#allocation2]  }
   0x6   :  { %v146_v6 = vld [vmem:[%s264_s2] ss:$0 sm:$0xff]  ;;  %s135_s27 = sshll.u32 %s206_s26, 4  ;;  %s136_s27 = int_to_ptr.vmem [resolvable:$true] %s135_s27 }
   0x7   :  { %164 = vmatpush3.bf16.msra.mxu0 %v177_v1  ;;  %s182_s0 = scalar_lea.vmem %s136_s27, 512  ;;  %p187_p1 = scmp.lt.s32.totalorder %s136_s27, %s136_s27 }
   0x8   :  { %165 = vmatprep.subr.bf16.mxu0 %v178_v2  ;;  %p183_p0 = scmp.ne.s32.totalorder %s136_s27, %s182_s0  ;;  %p188_p2 = scmp.lt.s32.totalorder %s182_s0, %s182_s0 }
   0xa   :  { %p189_p3 = por %p188_p2, %p187_p1 }
   0xb   :  { %166 = vmatpush3.bf16.msra.mxu0 %v178_v2 }
   0xc   :  { %167 = vmatprep.subr.bf16.mxu0 %v179_v4  ;;  %p190_p4 = pnand %p189_p3, %p183_p0 }
   0xf   :  { %168 = vmatpush3.bf16.msra.mxu0 %v179_v4 }
  0x12   :  { %170 = vmatmul.mubr.msk.bf16.vlgmr.msra.gmra.mrb[0].mxu0 %vm69_vm0, %v181_v5 }
  0xe5   :  { %v171_v7 = vpop.f32.mrb[0].mxu0 }
  0xe6   :  { %v119_v8 = vadd.f32 %v171_v7, %v146_v6  ;;  %v110_v9 = vpop.f32.mrb[1].mxu0 }
  0xe7   :  { %v111_v10 = vadd.f32 %v146_v6, %v110_v9  ;;  %v172_v11 = vpop.f32.mrb[2].mxu0 }
  0xe8   :  { %128 = vst.msk [vmem:[#allocation2 + $0x10] sm:$0xff] %vm125_vm1, %v119_v8  ;;  %v122_v12 = vadd.f32 %v172_v11, %v146_v6  ;;  %v113_v13 = vpop.f32.mrb[3].mxu0 }
  0xe9   :  { %126 = vst.msk [vmem:[#allocation2] sm:$0xff] %vm125_vm1, %v111_v10  ;;  %v114_v14 = vadd.f32 %v146_v6, %v113_v13 }
  0xea   :  { %129 = vst.msk [vmem:[#allocation2 + $0x18] sm:$0xff] %vm125_vm1, %v122_v12 }
  0xeb   :  { %127 = vst.msk [vmem:[#allocation2 + $0x8] sm:$0xff] %vm125_vm1, %v114_v14 }
  0xec   :  { %193 = shalt.err (!%p190_p4)
}
  0xed   :  { %s194_s28 = scalar_lea.hbm %s265_s3, 512 }
  0xee   :  { %p195_p5 = scmp.ne.s32.totalorder %s265_s3, %s194_s28  ;;  %p198_p6 = scmp.lt.u32.totalorder %s194_s28, %s265_s3 }
  0xf0   :  { %p200_p7 = pnand %p198_p6, %p195_p5 }
  0xf2   :  { %203 = shalt.err (!%p200_p7)
}
  0xf3   :  { %s207_s6 = smov 128   ;;  %s208_s7 = smov 8  }
  0xf4   :  { %141 = dma.vmem_to_hbm [thread:$0]  %s136_s27, 512, %s265_s3, [#allocation3], %s207_s6, %s207_s6, %s208_s7  }
  0xf5   :  { %204 = dma.done.wait [#allocation3], 512  }
  0xf6   :  { %205 = vsyncadd [#allocation3], 4294966784 }
  0xf7   :  { %145 = vsyncpa [#allocation3], 1 }

</bundles_post_ra>
